<compile_context>
chip_gen: v7x
topology: tpu7x:2x2x1
jax: 0.10.0
libtpu: 0.0.40
codegen_flags: <defaults>
</compile_context>

<pallas_src>
import jax
import jax.numpy as jnp
from jax import lax
from jax.experimental import pallas as pl
from jax.experimental.pallas import tpu as pltpu


def _downsample1d_kernel(t0_ref, t1_ref, t2_ref, w_ref, b_ref, o_ref):
    # t*_ref: (C_in, T_BLK) aligned taps
    # w_ref : (3, C_out, C_in)
    # b_ref : (C_out, 1)
    # o_ref : (C_out, T_BLK)
    acc = jnp.dot(w_ref[0], t0_ref[...], preferred_element_type=jnp.float32)
    acc = acc + jnp.dot(w_ref[1], t1_ref[...], preferred_element_type=jnp.float32)
    acc = acc + jnp.dot(w_ref[2], t2_ref[...], preferred_element_type=jnp.float32)
    o_ref[...] = (acc + b_ref[...]).astype(o_ref.dtype)


def _pick_t_blk(c, l_out, itemsize):
    """Length-tile size: full length if small, else a 128-multiple sized so the
    double-buffered streams (3 input taps + 1 output) stay within ~8 MiB."""
    if l_out <= 1024:
        return l_out
    budget = 8 * 1024 * 1024                       # bytes for all streamed tiles
    per_col = max(c, 8) * itemsize * 2 * 4         # 2 buffers x (3 in + 1 out)
    t = (budget // per_col) // 128 * 128
    return int(max(128, min(t, 1024)))


def downsample1d(x_ncl, weight_oik, bias_o):
    """Exact semantics of nn.Conv1d(dim, dim, kernel_size=3, stride=2, padding=1).

    x_ncl:      (B, C, L)        -- NCL, same as torch
    weight_oik: (C_out, C_in, 3) -- torch Conv1d weight layout
    bias_o:     (C_out,)
    returns:    (B, C_out, L_out), L_out = (L + 2*1 - 3)//2 + 1
    """
    B, C, L = x_ncl.shape
    C_out = weight_oik.shape[0]
    L_out = (L + 2 - 3) // 2 + 1

    # Glue: zero-pad the length axis and deinterleave into three aligned taps
    # (padded positions 2t, 2t+1, 2t+2).  No layout transposes are needed.
    # TODO(synk): fuse the pad + deinterleave into the kernel with strided
    # manual DMA (memory_space=pl.ANY + pl.ds(..., stride=2)) to drop this
    # extra wrapper HBM pass entirely (matters most on v5e).
    x_pad = jnp.pad(x_ncl, ((0, 0), (0, 0), (1, 1)))      # (B, C, L+2)
    tap0 = x_pad[:, :, 0::2][:, :, :L_out]                # x_pad[.., 2t]
    tap1 = x_pad[:, :, 1::2][:, :, :L_out]                # x_pad[.., 2t+1]
    tap2 = x_pad[:, :, 2::2][:, :, :L_out]                # x_pad[.., 2t+2]

    w_koi = jnp.transpose(weight_oik, (2, 0, 1))          # (3, C_out, C_in)
    b = bias_o.reshape(C_out, 1)

    T_BLK = _pick_t_blk(C, L_out, x_ncl.dtype.itemsize)
    grid = (B, pl.cdiv(L_out, T_BLK))

    tap_spec = pl.BlockSpec((None, C, T_BLK), lambda bi, ti: (bi, 0, ti))

    out = pl.pallas_call(
        _downsample1d_kernel,
        out_shape=jax.ShapeDtypeStruct((B, C_out, L_out), x_ncl.dtype),
        grid=grid,
        in_specs=[
            tap_spec,
            tap_spec,
            tap_spec,
            # Weights / bias: constant index_map -> fetched once, VMEM-resident.
            pl.BlockSpec((3, C_out, C), lambda bi, ti: (0, 0, 0)),
            pl.BlockSpec((C_out, 1), lambda bi, ti: (0, 0)),
        ],
        out_specs=pl.BlockSpec((None, C_out, T_BLK), lambda bi, ti: (bi, 0, ti)),
        compiler_params=pltpu.CompilerParams(
            dimension_semantics=("parallel", "parallel"),
            vmem_limit_bytes=32 * 1024 * 1024,
        ),
    )(tap0, tap1, tap2, w_koi, b)

    return out


if __name__ == "__main__":
    key = jax.random.PRNGKey(0)
    B, dim, L = 2, 4, 16
    kx, kw, kb = jax.random.split(key, 3)

    x = jax.random.normal(kx, (B, dim, L), dtype=jnp.float32)
    # Deterministic param init mimicking PyTorch Conv1d default:
    # U(-sqrt(k), sqrt(k)) with k = 1 / (C_in * kernel_size).
    bound = 1.0 / (dim * 3) ** 0.5
    w = jax.random.uniform(kw, (dim, dim, 3), minval=-bound, maxval=bound,
                           dtype=jnp.float32)
    b = jax.random.uniform(kb, (dim,), minval=-bound, maxval=bound,
                           dtype=jnp.float32)

    out = jax.jit(downsample1d)(x, w, b)
    out = jax.block_until_ready(out)

    # Pure-JAX reference with identical Conv1d semantics.
    ref = lax.conv_general_dilated(
        x, w, window_strides=(2,), padding=((1, 1),),
        dimension_numbers=("NCH", "OIH", "NCH")) + b[None, :, None]

    L_out = (L + 2 - 3) // 2 + 1
    assert out.shape == (B, dim, L_out)
    assert jnp.allclose(out, ref, atol=1e-5, rtol=1e-5)
    print("KERNEL_OK")
</pallas_src>

<mosaic_0001>
module attributes {stable_mosaic.version = 11 : i64} {
  func.func @_downsample1d_kernel(%arg0: i32, %arg1: i32, %arg2: memref<1x4x8xf32, #tpu.memory_space<vmem>>, %arg3: memref<1x4x8xf32, #tpu.memory_space<vmem>>, %arg4: memref<1x4x8xf32, #tpu.memory_space<vmem>>, %arg5: memref<3x4x4xf32, #tpu.memory_space<vmem>>, %arg6: memref<4x1xf32, #tpu.memory_space<vmem>>, %arg7: memref<1x4x8xf32, #tpu.memory_space<vmem>>) attributes {dimension_semantics = [#tpu.dimension_semantics<parallel>, #tpu.dimension_semantics<parallel>], iteration_bounds = array<i64: 2, 1>, scalar_prefetch = 0 : i64, scratch_operands = 0 : i64, tpu.core_type = #tpu.core_type<tc>, window_params = [{transform_indices = @transform_0, window_bounds = array<i64: 1, 4, 8>}, {transform_indices = @transform_1, window_bounds = array<i64: 1, 4, 8>}, {transform_indices = @transform_2, window_bounds = array<i64: 1, 4, 8>}, {pipeline_mode = #tpu.pipeline_mode<synchronous>, transform_indices = @transform_3, window_bounds = array<i64: 3, 4, 4>}, {pipeline_mode = #tpu.pipeline_mode<synchronous>, transform_indices = @transform_4, window_bounds = array<i64: 4, 1>}, {transform_indices = @transform_5, window_bounds = array<i64: 1, 4, 8>}]} {
    %c0 = arith.constant 0 : index
    %c0_0 = arith.constant 0 : index
    %c0_1 = arith.constant 0 : index
    %0 = vector.load %arg5[%c0, %c0_0, %c0_1] : memref<3x4x4xf32, #tpu.memory_space<vmem>>, vector<1x4x4xf32>
    %1 = vector.shape_cast %0 : vector<1x4x4xf32> to vector<4x4xf32>
    %c0_2 = arith.constant 0 : index
    %c0_3 = arith.constant 0 : index
    %c0_4 = arith.constant 0 : index
    %2 = vector.load %arg2[%c0_2, %c0_3, %c0_4] : memref<1x4x8xf32, #tpu.memory_space<vmem>>, vector<1x4x8xf32>
    %3 = vector.shape_cast %2 : vector<1x4x8xf32> to vector<4x8xf32>
    %cst = arith.constant dense<0.000000e+00> : vector<4x8xf32>
    %4 = tpu.matmul %1, %3, %cst {dimension_numbers = #tpu.dot_dimension_numbers<[1], [0], [0], [1], [0, 0, 1, 1], [], []>} : vector<4x4xf32>, vector<4x8xf32>, vector<4x8xf32> -> vector<4x8xf32>
    %c1 = arith.constant 1 : index
    %c0_5 = arith.constant 0 : index
    %c0_6 = arith.constant 0 : index
    %5 = vector.load %arg5[%c1, %c0_5, %c0_6] : memref<3x4x4xf32, #tpu.memory_space<vmem>>, vector<1x4x4xf32>
    %6 = vector.shape_cast %5 : vector<1x4x4xf32> to vector<4x4xf32>
    %c0_7 = arith.constant 0 : index
    %c0_8 = arith.constant 0 : index
    %c0_9 = arith.constant 0 : index
    %7 = vector.load %arg3[%c0_7, %c0_8, %c0_9] : memref<1x4x8xf32, #tpu.memory_space<vmem>>, vector<1x4x8xf32>
    %8 = vector.shape_cast %7 : vector<1x4x8xf32> to vector<4x8xf32>
    %cst_10 = arith.constant dense<0.000000e+00> : vector<4x8xf32>
    %9 = tpu.matmul %6, %8, %cst_10 {dimension_numbers = #tpu.dot_dimension_numbers<[1], [0], [0], [1], [0, 0, 1, 1], [], []>} : vector<4x4xf32>, vector<4x8xf32>, vector<4x8xf32> -> vector<4x8xf32>
    %10 = arith.addf %4, %9 : vector<4x8xf32>
    %c2 = arith.constant 2 : index
    %c0_11 = arith.constant 0 : index
    %c0_12 = arith.constant 0 : index
    %11 = vector.load %arg5[%c2, %c0_11, %c0_12] : memref<3x4x4xf32, #tpu.memory_space<vmem>>, vector<1x4x4xf32>
    %12 = vector.shape_cast %11 : vector<1x4x4xf32> to vector<4x4xf32>
    %c0_13 = arith.constant 0 : index
    %c0_14 = arith.constant 0 : index
    %c0_15 = arith.constant 0 : index
    %13 = vector.load %arg4[%c0_13, %c0_14, %c0_15] : memref<1x4x8xf32, #tpu.memory_space<vmem>>, vector<1x4x8xf32>
    %14 = vector.shape_cast %13 : vector<1x4x8xf32> to vector<4x8xf32>
    %cst_16 = arith.constant dense<0.000000e+00> : vector<4x8xf32>
    %15 = tpu.matmul %12, %14, %cst_16 {dimension_numbers = #tpu.dot_dimension_numbers<[1], [0], [0], [1], [0, 0, 1, 1], [], []>} : vector<4x4xf32>, vector<4x8xf32>, vector<4x8xf32> -> vector<4x8xf32>
    %16 = arith.addf %10, %15 : vector<4x8xf32>
    %c0_17 = arith.constant 0 : index
    %c0_18 = arith.constant 0 : index
    %17 = vector.load %arg6[%c0_17, %c0_18] : memref<4x1xf32, #tpu.memory_space<vmem>>, vector<4x1xf32>
    %18 = vector.broadcast %17 : vector<4x1xf32> to vector<4x8xf32>
    %19 = arith.addf %16, %18 : vector<4x8xf32>
    %c0_19 = arith.constant 0 : index
    %c0_20 = arith.constant 0 : index
    %c0_21 = arith.constant 0 : index
    %20 = vector.load %arg7[%c0_19, %c0_20, %c0_21] : memref<1x4x8xf32, #tpu.memory_space<vmem>>, vector<1x4x8xf32>
    %21 = vector.shape_cast %20 : vector<1x4x8xf32> to vector<4x8xf32>
    %22 = vector.shape_cast %19 : vector<4x8xf32> to vector<1x4x8xf32>
    tpu.vector_store %arg7[%c0_19, %c0_20, %c0_21], %22 {strides = array<i32>} : memref<1x4x8xf32, #tpu.memory_space<vmem>>, vector<1x4x8xf32>,
    return
  }
  func.func @transform_0(%arg0: i32, %arg1: i32) -> (i32, i32, i32) {
    %c0_i32 = arith.constant 0 : i32
    %c0_i32_0 = arith.constant 0 : i32
    return %arg0, %c0_i32, %arg1 : i32, i32, i32
  }
  func.func @transform_1(%arg0: i32, %arg1: i32) -> (i32, i32, i32) {
    %c0_i32 = arith.constant 0 : i32
    %c0_i32_0 = arith.constant 0 : i32
    return %arg0, %c0_i32, %arg1 : i32, i32, i32
  }
  func.func @transform_2(%arg0: i32, %arg1: i32) -> (i32, i32, i32) {
    %c0_i32 = arith.constant 0 : i32
    %c0_i32_0 = arith.constant 0 : i32
    return %arg0, %c0_i32, %arg1 : i32, i32, i32
  }
  func.func @transform_3(%arg0: i32, %arg1: i32) -> (i32, i32, i32) {
    %c0_i32 = arith.constant 0 : i32
    %c0_i32_0 = arith.constant 0 : i32
    %c0_i32_1 = arith.constant 0 : i32
    %c0_i32_2 = arith.constant 0 : i32
    return %c0_i32, %c0_i32_0, %c0_i32_1 : i32, i32, i32
  }
  func.func @transform_4(%arg0: i32, %arg1: i32) -> (i32, i32) {
    %c0_i32 = arith.constant 0 : i32
    %c0_i32_0 = arith.constant 0 : i32
    %c0_i32_1 = arith.constant 0 : i32
    return %c0_i32, %c0_i32_0 : i32, i32
  }
  func.func @transform_5(%arg0: i32, %arg1: i32) -> (i32, i32, i32) {
    %c0_i32 = arith.constant 0 : i32
    %c0_i32_0 = arith.constant 0 : i32
    return %arg0, %c0_i32, %arg1 : i32, i32, i32
  }
}

</mosaic_0001>

<bundles_post_ra>
// kernel: downsample1d.1
= control target key start
LH: loop header
LB: loop body
LE: loop exit
PB: predicated region body
PF: predicated region fallthrough
CT: control target
= control target key end

     0   :  { %10 = vsyncpa [#allocation3], 0  ;;  %s1016_s0 = inlined_call_operand.vmem [shape: f32[2,4,8], index: 0, kind: input, shape index: {}]   ;;  %s1017_s1 = inlined_call_operand.vmem [shape: f32[2,4,8], index: 1, kind: input, shape index: {}]   ;;  %s1018_s2 = inlined_call_operand.vmem [shape: f32[2,4,8], index: 2, kind: input, shape index: {}]   ;;  %s1019_s3 = inlined_call_operand.vmem [shape: f32[3,4,4], index: 3, kind: input, shape index: {}]   ;;  %s1020_s4 = inlined_call_operand.vmem [shape: f32[4,1], index: 4, kind: input, shape index: {}]   ;;  %s1021_s5 = inlined_call_operand.hbm [shape: f32[2,4,8], index: 5, kind: output, shape index: {}]  }
   0x1   :  { %12 = vsyncpa [#allocation3 + $0x1], 0  ;;  %s880_s18 = smov 0   ;;  %s882_s19 = smov 0  }
   0x2   :  { %s884_s20 = smov 0   ;;  %s886_s21 = smov 0  }
   0x3   :  { %s888_s22 = smov 0   ;;  %s890_s23 = smov 0  }
   0x4 LB: > { %s665_s24 = sadd.s32 4294967295, %s844_s23   ;;  %s666_s25 = sadd.s32 4294967294, %s844_s23   ;;  %s844_s23 = sphi %s890_s23, %s18_s23   ;;  %s840_s22 = sphi %s888_s22, %s1028_s22   ;;  %s836_s21 = sphi %s886_s21, %s1027_s21   ;;  %s832_s20 = sphi %s884_s20, %s1026_s20   ;;  %s828_s19 = sphi %s882_s19, %s1025_s19   ;;  %s824_s18 = sphi %s880_s18, %s1024_s18  }
   0x5   : > { %s30_s26 = sadd.s32 1, %s840_s22  ;;  %s165_s27 = sadd.s32 1, %s832_s20 }
   0x6   : > { %p32_p0 = scmp.ge.s32.totalorder %s30_s26, 2  ;;  %p175_p1 = scmp.ne.s32.totalorder %s832_s20, %s828_s19 }
   0x7   : > { %p176_p2 = scmp.eq.s32.totalorder %s665_s24, 1  ;;  %p181_p3 = scmp.ne.s32.totalorder %s828_s19, %s824_s18 }
   0x8   : > { %s1030_s26 = smov (%p32_p0, %s30_s26), 0  ;;  %p182_p5 = scmp.eq.s32.totalorder %s666_s25, 1 }
   0x9   : > { %p920_p4 = por %p176_p2, %p175_p1  ;;  %s160_s29 = ssub.s32 %s840_s22, %s1030_s26 }
   0xa   : > { %p669_p6 = scmp.ge.s32.totalorder %s844_s23, 1  ;;  %p163_p7 = scmp.eq.s32.totalorder %s160_s29, 0 }
   0xb   : > { %p927_p8 = por %p182_p5, %p181_p3  ;;  %p236_p9 = scmp.lt.s32.totalorder %s844_s23, 3 }
   0xc   : > { %s933_s6 = scalar_select %p163_p7, %s832_s20, %s165_s27  }
   0xd   : > { %p237_p10 = pnand %p669_p6, %p236_p9 }
   0xe   : > { %p280_p11 = scmp.lt.s32.totalorder (!%p237_p10), %s836_s21, 1  ;;  %v846_v0 = vmov (!%p237_p10), 0.0   ;;  %vm847_vm0 = vmmov (!%p237_p10), 0   ;;  %v540_v1 = vld [vmem:[%s1020_s4] sm:$0xf] (!%p237_p10)  ;;  %v848_v2 = vmov (!%p237_p10), 0  }
   0xf   : > { %240 = sbr.rel (%p237_p10) target bundleno = 262 (0x106), region = 40  ;;  %692 = vmatprep.subr.mxu0 (!%p237_p10), %v846_v0  ;;  %694 = vmatprep.mubr.msk.f32.mxu0 (!%p237_p10), %vm847_vm0, %v846_v0  ;;  %vm310_vm1 = vcmask (!%p237_p10), 1043456   ;;  %v674_v3 = vld [vmem:[%s1019_s3 + $0x4] sm:$0xf] (!%p237_p10)  ;;  %vm306_vm2 = vcmask (!%p237_p10), 31744   ;;  %s277_s12 = sand.u32 (!%p237_p10), 1, %s828_s19  }
  0x10   : > { %697 = vmatprep.subr.mxu1 (!%p237_p10), %v846_v0  ;;  %699 = vmatprep.mubr.msk.f32.mxu1 (!%p237_p10), %vm847_vm0, %v846_v0  ;;  %v301_v6 = vld [vmem:[%s1019_s3] sm:$0xf] (!%p237_p10)  ;;  %v679_v8 = vld [vmem:[%s1019_s3 + $0x8] sm:$0xf] (!%p237_p10)  ;;  %vm547_vm3 = vcmask (!%p237_p10), 60416   ;;  %s550_s25 = scalar_lea.sflag (!%p237_p10), [#allocation3], %s277_s12 }
  0x11   : > { %765 = vset.pattern.permute.xlu0 (!%p237_p10), %v848_v2 }
  0x12   : > { %543 = vperm.xlu0 (!%p237_p10), %765, %v540_v1  }
  0x16   : > { %s281_s7 = scalar_select %p280_p11, %s836_s21, 1 }
  0x18   : > { %s671_s10 = sshll.u32 %s281_s7, 2 }
  0x19   : > { %s293_s13 = scalar_lea.vmem %s1017_s1, %s671_s10  ;;  %s286_s24 = scalar_lea.vmem %s1016_s0, %s671_s10 }
  0x1a   : > { %v305_v4 = vld [vmem:[%s293_s13] sm:$0xf]  ;;  %s300_s8 = scalar_lea.vmem %s1018_s2, %s671_s10  ;;  %s670_s10 = sshll.u32 %s277_s12, 2 }
  0x1b   : > { %v302_v5 = vld [vmem:[%s286_s24] sm:$0xf]  ;;  %693 = vmatpush3.msk.msra.mxu0 %vm310_vm1, %v305_v4  ;;  %s683_s13 = sshll.u32 %s836_s21, 6  ;;  %s279_s14 = scalar_lea.vmem [#allocation2], %s670_s10 }
  0x1c   : > { %698 = vmatpush3.msk.msra.mxu1 %vm310_vm1, %v302_v5  ;;  %v462_v7 = vld [vmem:[%s300_s8] sm:$0xf]  ;;  %695 = vmatmul.mubr.msk.f32.vlgmr.msra.gmra.mrb[0].mxu0 %vm306_vm2, %v674_v3  ;;  %s564_s15 = sshll.u32 %s279_s14, 4  ;;  %s969_s24 = scalar_lea.hbm %s1021_s5, %s683_s13  ;;  %s971_s15 = int_to_ptr.vmem [resolvable:$true] %s564_s15 }
  0x1d   : > { %702 = vmatprep.subr.mxu0 %v846_v0  ;;  %700 = vmatmul.mubr.msk.f32.vlgmr.msra.gmra.mrb[0].mxu1 %vm306_vm2, %v301_v6  ;;  %s766_s27 = scalar_lea.vmem %s971_s15, 64  ;;  %s849_s21 = smov [#allocation2]  }
  0x1e   : > { %703 = vmatpush3.msk.msra.mxu0 %vm310_vm1, %v462_v7  ;;  %704 = vmatprep.mubr.msk.f32.mxu0 %vm847_vm0, %v846_v0  ;;  %p767_p12 = scmp.ne.s32.totalorder %s971_s15, %s766_s27  ;;  %s770_s29 = sshll.u32 %s849_s21, 4  ;;  %s771_s29 = int_to_ptr.vmem [resolvable:$false] %s770_s29 }
  0x1f   : > { %s772_s7 = scalar_lea.vmem %s771_s29, 128  ;;  %p773_p1 = scmp.lt.s32.totalorder %s971_s15, %s771_s29 }
  0x20   : > { %705 = vmatmul.mubr.msk.f32.vlgmr.msra.gmra.mrb[2].mxu0 %vm306_vm2, %v679_v8  ;;  %p768_p13 = pnand %p767_p12, %p920_p4  ;;  %p774_p2 = scmp.lt.s32.totalorder %s772_s7, %s766_s27 }
  0x22   : > { %p769_p0 = pneg %p768_p13  ;;  %p775_p3 = por %p774_p2, %p773_p1 }
  0x24   : > { %p776_p5 = pnand %p775_p3, %p769_p0 }
  0x91   : > { %v544_v15 = vpop.permute.xlu0 %543 }
  0xef   : > { %v380_v9 = vpop.f32.mrb[0].mxu0 }
  0xf0   : > { %v696_v10 = vpop.f32.mrb[1].mxu0  ;;  %v456_v11 = vpop.f32.mrb[0].mxu1 }
  0xf1   : > { %v457_v12 = vadd.f32 %v456_v11, %v380_v9  ;;  %v701_v13 = vpop.f32.mrb[1].mxu1 }
  0xf3   : > { %v535_v14 = vpop.f32.mrb[2].mxu0 }
  0xf4   : > { %v539_v16 = vadd.f32 %v535_v14, %v457_v12  ;;  %v706_v17 = vpop.f32.mrb[3].mxu0 }
  0xf6   : > { %v546_v18 = vadd.f32 %v544_v15, %v539_v16 }
  0xf8   : > { %548 = vst.msk [vmem:[%s279_s14] sm:$0xf] %vm547_vm3, %v546_v18 }
  0xf9   : > { %779 = shalt.err (!%p776_p5)
}
  0xfa   : > { %s780_s8 = scalar_lea.hbm %s969_s24, 64  ;;  %s784_s12 = scalar_lea.hbm %s1021_s5, 128 }
  0xfb   : > { %p781_p6 = scmp.ne.s32.totalorder %s969_s24, %s780_s8  ;;  %p785_p10 = scmp.lt.u32.totalorder %s969_s24, %s1021_s5 }
  0xfc   : > { %p786_p11 = scmp.lt.u32.totalorder %s784_s12, %s780_s8  ;;  %p788_p13 = scmp.lt.u32.totalorder %s780_s8, %s969_s24 }
  0xfd   : > { %p782_p7 = pnand %p781_p6, %p920_p4 }
  0xfe   : > { %p787_p12 = por %p786_p11, %p785_p10 }
  0xff   : > { %p783_p9 = pneg %p782_p7 }
 0x100   : > { %p789_p0 = por %p788_p13, %p787_p12 }
 0x102   : > { %p790_p1 = pnand %p789_p0, %p783_p9 }
 0x104   : > { %793 = shalt.err (!%p790_p1)
}
 0x105   : > { %707 = dma.vmem_to_hbm [thread:$0]  (%p920_p4), %s971_s15, 64, %s969_s24, %s550_s25  }
 0x106 PF: > { %p713_p2 = scmp.ge.s32.totalorder %s844_s23, 2  ;;  %s576_s14 = sand.u32 1, %s824_s18  }
 0x107   : > { %s577_s16 = scalar_lea.sflag [#allocation3], %s576_s14 }
 0x108   : > { %p710_p3 = pnand %p713_p2, %p927_p8 }
 0x10a   : > { %819 = dma.done.wait (!%p710_p3), %s577_s16, 64  }
 0x10b   : > { %821 = vsyncadd (!%p710_p3), %s577_s16, 4294967232  ;;  %s18_s23 = sadd.s32 1, %s844_s23   ;;  %s1024_s18 = smov %s828_s19 }
 0x10c   : > { %p15_p5 = scmp.ge.s32.totalorder %s18_s23, 4   ;;  %s1025_s19 = smov %s832_s20 }
 0x10d   : > { %s1026_s20 = smov %s933_s6  ;;  %s1027_s21 = smov %s840_s22 }
 0x10e   : > { %s1028_s22 = smov %s1030_s26  ;;  %17 = sbr.rel (!%p15_p5) target bundleno = 4 (0x4), region = 83 }
 0x115   :  { %582 = vsyncpa [#allocation3], 1 }
 0x116   :  { %584 = vsyncpa [#allocation3 + $0x1], 1 }

</bundles_post_ra>
